<compile_context>
chip_gen: v5e
topology: v5e:2x2
jax: 0.10.0
libtpu: 0.0.40
codegen_flags: <defaults>
</compile_context>

<pallas_src>
import math
import functools

import jax
import jax.numpy as jnp
from jax.experimental import pallas as pl
from jax.experimental.pallas import tpu as pltpu

MATMUL_DTYPE = jnp.bfloat16   # MXU-native on v5e / v6e / v7x
LN_EPS = 1e-5                 # PyTorch nn.LayerNorm default eps


def _layernorm(y, gamma, beta, eps=LN_EPS):
    mu = jnp.mean(y, axis=-1, keepdims=True)
    yc = y - mu
    var = jnp.mean(yc * yc, axis=-1, keepdims=True)
    return yc * jax.lax.rsqrt(var + eps) * gamma + beta


# ---------------------------------------------------------------------------
# Kernels
# ---------------------------------------------------------------------------

def _linear_kernel(x_ref, w_ref, b_ref, o_ref):
    """o = x @ w + b for one row-tile."""
    acc = jnp.dot(x_ref[...].astype(w_ref.dtype), w_ref[...],
                  preferred_element_type=jnp.float32) + b_ref[...]
    o_ref[...] = acc.astype(o_ref.dtype)


def _block_kernel(x_ref, wqkv_ref, bqkv_ref, wo_ref, bo_ref,
                  g1_ref, be1_ref, w1_ref, b1_ref, w2_ref, b2_ref,
                  g2_ref, be2_ref, o_ref, *, heads, dim_head):
    """One fused Transformer block for a (Bt, N, D) batch tile (one grid step)."""
    x = x_ref[...]                                   # (Bt, N, D) f32 residual stream
    Bt, N, D = x.shape
    dh = dim_head
    inner = heads * dh
    scale = 1.0 / math.sqrt(dh)

    x2d = x.reshape(Bt * N, D)                       # flatten batch into MXU rows
    x_bf = x2d.astype(MATMUL_DTYPE)

    # ---------------- LSA ----------------
    # Fused QKV: one lane-aligned 2D MXU matmul, weights packed [Q_all | K_all | V_all].
    qkv = jnp.dot(x_bf, wqkv_ref[...],
                  preferred_element_type=jnp.float32) + bqkv_ref[...]   # (Bt*N, 3*inner)

    def split_heads(t):                              # mirrors transpose_qkv
        t = t.reshape(Bt, N, heads, dh).transpose(0, 2, 1, 3)
        return t.reshape(Bt * heads, N, dh).astype(MATMUL_DTYPE)

    q = split_heads(qkv[:, 0 * inner:1 * inner])     # lane slices at multiples of inner
    k = split_heads(qkv[:, 1 * inner:2 * inner])
    v = split_heads(qkv[:, 2 * inner:3 * inner])

    # Scaled dot-product attention, batched over (batch * heads); contraction on
    # the trailing dh axis (no explicit k.T).
    s = jnp.einsum("bnd,bmd->bnm", q, k,
                   preferred_element_type=jnp.float32) * scale
    s = s - jnp.max(s, axis=-1, keepdims=True)       # stable softmax
    p = jnp.exp(s)
    p = p * pl.reciprocal(jnp.sum(p, axis=-1, keepdims=True), approx=True)
    ctx = jnp.einsum("bnm,bmd->bnd", p.astype(MATMUL_DTYPE), v,
                     preferred_element_type=jnp.float32)                # (Bt*heads, N, dh)

    # Merge heads (one relayout) and project with a single (inner, D) matmul.
    ctx = ctx.reshape(Bt, heads, N, dh).transpose(0, 2, 1, 3).reshape(Bt * N, inner)
    attn = jnp.dot(ctx.astype(MATMUL_DTYPE), wo_ref[...],
                   preferred_element_type=jnp.float32) + bo_ref[...]    # (Bt*N, D)

    # ---------------- AddNorm 1: x + LayerNorm(attn) ----------------
    h1 = x2d + _layernorm(attn, g1_ref[...], be1_ref[...])

    # ---------------- FeedForward ----------------
    f = jnp.dot(h1.astype(MATMUL_DTYPE), w1_ref[...],
                preferred_element_type=jnp.float32) + b1_ref[...]
    # TODO(synk): nn.GELU() is erf-exact; tanh-approx GELU used in-kernel (EUP tanh), max dev ~3e-3.
    f = jax.nn.gelu(f, approximate=True)
    f = jnp.dot(f.astype(MATMUL_DTYPE), w2_ref[...],
                preferred_element_type=jnp.float32) + b2_ref[...]

    # ---------------- AddNorm 2 ----------------
    out = h1 + _layernorm(f, g2_ref[...], be2_ref[...])
    o_ref[...] = out.reshape(Bt, N, D).astype(o_ref.dtype)


def _head_kernel(x_ref, g_ref, b_ref, w_ref, bh_ref, o_ref):
    """mlp_head: Linear(LayerNorm(cls_tokens))."""
    y = _layernorm(x_ref[...], g_ref[...], b_ref[...])
    o_ref[...] = (jnp.dot(y, w_ref[...], preferred_element_type=jnp.float32)
                  + bh_ref[...]).astype(o_ref.dtype)


# ---------------------------------------------------------------------------
# Tiling / budgeting helpers
# ---------------------------------------------------------------------------

def _pick_row_tile(M, target=512):
    """Largest multiple-of-8 divisor of M that is <= target (or M itself)."""
    if M <= target:
        return M
    for t in range(target, 7, -1):
        if M % t == 0 and t % 8 == 0:
            return t
    return M


def _pick_batch_tile(B, N, max_rows=1024):
    """Largest divisor Bt of B that keeps the grid >= 2 (megacore) and Bt*N small enough."""
    best = 1
    for bt in range(1, B + 1):
        if B % bt:
            continue
        if bt * N > max_rows:
            continue
        if B >= 2 and B // bt < 2:
            continue
        best = bt
    return best


def _block_vmem_limit(Bt, N, D, inner, mlp):
    """Explicit VMEM budget for one transformer-block pallas_call."""
    bf16, f32 = 2, 4
    weights = (D * 3 * inner + inner * D + D * mlp + mlp * D) * bf16
    biases = (3 * inner + 6 * D + mlp) * f32
    io = Bt * N * D * f32 * 2                       # x block in + out block
    acts = Bt * N * (3 * inner + mlp + 2 * D) * f32
    est = 2 * (weights + biases + io) + acts        # pipelined blocks are double-buffered
    # TODO(synk): for ViT-Base-class dims on v7x (64 MiB VMEM) tile the FFN over mlp_dim
    # instead of just raising this limit.
    return int(min(100 * 1024 * 1024, max(32 * 1024 * 1024, 2 * est)))


# ---------------------------------------------------------------------------
# Wrappers
# ---------------------------------------------------------------------------

def _linear(x2d, w, b):
    """Row-tiled, pipelined x @ w + b (patch embedding)."""
    M, K = x2d.shape
    N = w.shape[1]
    tm = _pick_row_tile(M)
    return pl.pallas_call(
        _linear_kernel,
        out_shape=jax.ShapeDtypeStruct((M, N), jnp.float32),
        grid_spec=pltpu.PrefetchScalarGridSpec(
            num_scalar_prefetch=0,
            grid=(M // tm,),
            in_specs=[pl.BlockSpec((tm, K), lambda i: (i, 0)),
                      pl.BlockSpec((K, N), lambda i: (0, 0)),   # weight resident
                      pl.BlockSpec((1, N), lambda i: (0, 0))],
            out_specs=pl.BlockSpec((tm, N), lambda i: (i, 0)),
        ),
        compiler_params=pltpu.CompilerParams(dimension_semantics=("parallel",)),
    )(x2d, w, b)


def _transformer_block(x, pblk, *, heads, dim_head, block_b, vmem_limit):
    B, N, D = x.shape
    inner = heads * dim_head
    mlp_dim = pblk["w_ff1"].shape[1]

    def const(shape):                               # resident across the batch grid
        zeros = (0,) * len(shape)
        return pl.BlockSpec(shape, lambda b, _z=zeros: _z)

    kernel = functools.partial(_block_kernel, heads=heads, dim_head=dim_head)
    return pl.pallas_call(
        kernel,
        out_shape=jax.ShapeDtypeStruct((B, N, D), x.dtype),
        grid_spec=pltpu.PrefetchScalarGridSpec(
            num_scalar_prefetch=0,
            grid=(B // block_b,),
            in_specs=[
                pl.BlockSpec((block_b, N, D), lambda b: (b, 0, 0)),   # x batch tile
                const((D, 3 * inner)), const((1, 3 * inner)),         # fused Wqkv, bqkv
                const((inner, D)), const((1, D)),                     # Wo, bo
                const((1, D)), const((1, D)),                         # ln1 gamma, beta
                const((D, mlp_dim)), const((1, mlp_dim)),             # Wff1, bff1
                const((mlp_dim, D)), const((1, D)),                   # Wff2, bff2
                const((1, D)), const((1, D)),                         # ln2 gamma, beta
            ],
            out_specs=pl.BlockSpec((block_b, N, D), lambda b: (b, 0, 0)),
        ),
        compiler_params=pltpu.CompilerParams(
            dimension_semantics=("parallel",),      # batch axis -> both TCs on v7x
            vmem_limit_bytes=vmem_limit),
    )(x, pblk["w_qkv"], pblk["b_qkv"], pblk["w_o"], pblk["b_o"],
      pblk["ln1_g"], pblk["ln1_b"], pblk["w_ff1"], pblk["b_ff1"],
      pblk["w_ff2"], pblk["b_ff2"], pblk["ln2_g"], pblk["ln2_b"])


def _mlp_head(cls_x, g, b, w, bh):
    B, nc = cls_x.shape[0], w.shape[1]
    return pl.pallas_call(
        _head_kernel,
        out_shape=jax.ShapeDtypeStruct((B, nc), jnp.float32),
    )(cls_x, g, b, w, bh)


# ---------------------------------------------------------------------------
# One-time parameter packing (off the hot path)
# ---------------------------------------------------------------------------

def pack_params(params, cfg):
    """Pack / pre-cast weights once into kernel-ready layouts."""
    packed = {
        "w_pe": params["w_pe"].astype(MATMUL_DTYPE),
        "b_pe": params["b_pe"],
        "cls_token": params["cls_token"],
        "pos_embedding": params["pos_embedding"],
        "head_ln_g": params["head_ln_g"],
        "head_ln_b": params["head_ln_b"],
        "w_head": params["w_head"],
        "b_head": params["b_head"],
        "blocks": [],
    }
    for blk in params["blocks"]:
        packed["blocks"].append({
            # fused QKV, ordered [Q_all | K_all | V_all] -> lane-aligned slices in-kernel
            "w_qkv": jnp.concatenate([blk["w_q"], blk["w_k"], blk["w_v"]],
                                     axis=1).astype(MATMUL_DTYPE),       # (D, 3*inner)
            "b_qkv": jnp.concatenate([blk["b_q"], blk["b_k"], blk["b_v"]],
                                     axis=1),                             # (1, 3*inner) f32
            "w_o": blk["w_o"].astype(MATMUL_DTYPE),                       # (inner, D)
            "b_o": blk["b_o"],
            "ln1_g": blk["ln1_g"], "ln1_b": blk["ln1_b"],
            "w_ff1": blk["w_ff1"].astype(MATMUL_DTYPE), "b_ff1": blk["b_ff1"],
            "w_ff2": blk["w_ff2"].astype(MATMUL_DTYPE), "b_ff2": blk["b_ff2"],
            "ln2_g": blk["ln2_g"], "ln2_b": blk["ln2_b"],
        })
    return packed


# ---------------------------------------------------------------------------
# Forward
# ---------------------------------------------------------------------------

def vit_forward(images, packed, cfg):
    B, C, H, W = images.shape
    p = cfg["patch_size"]
    h, w = H // p, W // p
    dim, heads, dh = cfg["dim"], cfg["heads"], cfg["dim_head"]
    inner = heads * dh
    mlp_dim = cfg["mlp_dim"]

    # einops Rearrange 'b c (h p1) (w p2) -> b (h w) (p1 p2 c)'  (pure layout, host side)
    patches = images.reshape(B, C, h, p, w, p).transpose(0, 2, 4, 3, 5, 1)
    patches = patches.reshape(B, h * w, p * p * C)

    # patch embedding linear (Pallas, row-tiled)
    x = _linear(patches.reshape(B * h * w, -1), packed["w_pe"], packed["b_pe"])
    x = x.reshape(B, h * w, dim)

    # cls token + positional embedding (tiny layout/elementwise glue, host side)
    cls = jnp.broadcast_to(packed["cls_token"], (B, 1, dim))
    x = jnp.concatenate([cls, x], axis=1)
    x = x + packed["pos_embedding"][:, : x.shape[1]]
    # emb_dropout p=0.0 -> identity

    N = x.shape[1]
    block_b = _pick_batch_tile(B, N)
    vmem_limit = _block_vmem_limit(block_b, N, dim, inner, mlp_dim)
    for pblk in packed["blocks"]:
        x = _transformer_block(x, pblk, heads=heads, dim_head=dh,
                               block_b=block_b, vmem_limit=vmem_limit)

    cls_out = x[:, 0]                                # pool == 'cls'
    return _mlp_head(cls_out, packed["head_ln_g"], packed["head_ln_b"],
                     packed["w_head"], packed["b_head"])


# ---------------------------------------------------------------------------
# Pure-JAX reference (mirrors the PyTorch module, f32 / exact GELU)
# ---------------------------------------------------------------------------

def vit_reference(images, params, cfg):
    B, C, H, W = images.shape
    p = cfg["patch_size"]
    h, w = H // p, W // p
    heads, dh, dim = cfg["heads"], cfg["dim_head"], cfg["dim"]

    x = images.reshape(B, C, h, p, w, p).transpose(0, 2, 4, 3, 5, 1)
    x = x.reshape(B, h * w, p * p * C)
    x = x @ params["w_pe"] + params["b_pe"]
    cls = jnp.broadcast_to(params["cls_token"], (B, 1, dim))
    x = jnp.concatenate([cls, x], axis=1)
    x = x + params["pos_embedding"][:, : x.shape[1]]

    def ln(y, g, b):
        mu = y.mean(-1, keepdims=True)
        var = ((y - mu) ** 2).mean(-1, keepdims=True)
        return (y - mu) / jnp.sqrt(var + LN_EPS) * g + b

    for blk in params["blocks"]:
        N = x.shape[1]
        q = x @ blk["w_q"] + blk["b_q"]
        k = x @ blk["w_k"] + blk["b_k"]
        v = x @ blk["w_v"] + blk["b_v"]

        def split(t):   # transpose_qkv
            return t.reshape(B, N, heads, dh).transpose(0, 2, 1, 3).reshape(B * heads, N, dh)

        q, k, v = split(q), split(k), split(v)
        wgt = jnp.einsum("bnd,bmd->bnm", q, k) / math.sqrt(dh)
        pr = jax.nn.softmax(wgt, axis=-1)
        o = jnp.einsum("bnm,bmd->bnd", pr, v)
        o = o.reshape(B, heads, N, dh).transpose(0, 2, 1, 3).reshape(B, N, heads * dh)
        attn = o @ blk["w_o"] + blk["b_o"]
        x = x + ln(attn, blk["ln1_g"], blk["ln1_b"])

        f = x @ blk["w_ff1"] + blk["b_ff1"]
        f = jax.nn.gelu(f, approximate=False)        # exact erf GELU, as nn.GELU()
        f = f @ blk["w_ff2"] + blk["b_ff2"]
        x = x + ln(f, blk["ln2_g"], blk["ln2_b"])

    cls_out = x[:, 0]
    y = ln(cls_out, params["head_ln_g"], params["head_ln_b"])
    return y @ params["w_head"] + params["b_head"]


# ---------------------------------------------------------------------------
# Deterministic parameter init
# ---------------------------------------------------------------------------

def init_params(key, cfg):
    dim, heads, dh = cfg["dim"], cfg["heads"], cfg["dim_head"]
    mlp, depth, nc = cfg["mlp_dim"], cfg["depth"], cfg["num_classes"]
    inner = heads * dh
    patch_dim = cfg["channels"] * cfg["patch_size"] ** 2
    num_patches = (cfg["image_size"] // cfg["patch_size"]) ** 2

    keys = iter(jax.random.split(key, 64))
    nrm = lambda shape, s: s * jax.random.normal(next(keys), shape, jnp.float32)

    def block_params():
        s_in, s_inner, s_mlp = 1 / math.sqrt(dim), 1 / math.sqrt(inner), 1 / math.sqrt(mlp)
        return {
            "w_q": nrm((dim, inner), s_in), "b_q": nrm((1, inner), 0.02),
            "w_k": nrm((dim, inner), s_in), "b_k": nrm((1, inner), 0.02),
            "w_v": nrm((dim, inner), s_in), "b_v": nrm((1, inner), 0.02),
            "w_o": nrm((inner, dim), s_inner), "b_o": nrm((1, dim), 0.02),
            "ln1_g": 1.0 + nrm((1, dim), 0.1), "ln1_b": nrm((1, dim), 0.05),
            "w_ff1": nrm((dim, mlp), s_in), "b_ff1": nrm((1, mlp), 0.02),
            "w_ff2": nrm((mlp, dim), s_mlp), "b_ff2": nrm((1, dim), 0.02),
            "ln2_g": 1.0 + nrm((1, dim), 0.1), "ln2_b": nrm((1, dim), 0.05),
        }

    return {
        "w_pe": nrm((patch_dim, dim), 1 / math.sqrt(patch_dim)),
        "b_pe": nrm((1, dim), 0.02),
        "cls_token": nrm((1, 1, dim), 0.5),
        "pos_embedding": nrm((1, num_patches + 1, dim), 0.5),
        "blocks": [block_params() for _ in range(depth)],
        "head_ln_g": 1.0 + nrm((1, dim), 0.1),
        "head_ln_b": nrm((1, dim), 0.05),
        "w_head": nrm((dim, nc), 1 / math.sqrt(dim)),
        "b_head": nrm((1, nc), 0.02),
    }


if __name__ == "__main__":
    cfg = dict(image_size=16, patch_size=4, channels=3, dim=32, depth=2,
               heads=4, dim_head=16, mlp_dim=64, num_classes=10)

    key = jax.random.PRNGKey(0)
    k_img, k_par = jax.random.split(key)
    images = jax.random.normal(
        k_img, (2, cfg["channels"], cfg["image_size"], cfg["image_size"]), jnp.float32)
    params = init_params(k_par, cfg)
    packed = pack_params(params, cfg)     # one-time weight packing, off the hot path

    out = vit_forward(images, packed, cfg)
    out = jax.block_until_ready(out)

    ref = vit_reference(images, params, cfg)
    assert out.shape == (2, cfg["num_classes"])
    max_err = float(jnp.max(jnp.abs(out - ref)))
    # bf16 matmuls + tanh-GELU + approx softmax recip in the kernel vs f32 / erf-GELU reference.
    assert jnp.allclose(out, ref, atol=1e-1, rtol=1e-1), \
        f"mismatch vs reference (max abs err {max_err:.4f})"

    print("KERNEL_OK")
</pallas_src>

<mosaic_0001>
module attributes {stable_mosaic.version = 11 : i64} {
  func.func @_linear_kernel(%arg0: i32, %arg1: memref<32x48xf32, #tpu.memory_space<vmem>>, %arg2: memref<48x32xbf16, #tpu.memory_space<vmem>>, %arg3: memref<1x32xf32, #tpu.memory_space<vmem>>, %arg4: memref<32x32xf32, #tpu.memory_space<vmem>>) attributes {dimension_semantics = [#tpu.dimension_semantics<parallel>], iteration_bounds = array<i64: 1>, scalar_prefetch = 0 : i64, scratch_operands = 0 : i64, tpu.core_type = #tpu.core_type<tc>, window_params = [{transform_indices = @transform_0, window_bounds = array<i64: 32, 48>}, {pipeline_mode = #tpu.pipeline_mode<synchronous>, transform_indices = @transform_1, window_bounds = array<i64: 48, 32>}, {pipeline_mode = #tpu.pipeline_mode<synchronous>, transform_indices = @transform_2, window_bounds = array<i64: 1, 32>}, {transform_indices = @transform_3, window_bounds = array<i64: 32, 32>}]} {
    %c0 = arith.constant 0 : index
    %c0_0 = arith.constant 0 : index
    %0 = vector.load %arg1[%c0, %c0_0] : memref<32x48xf32, #tpu.memory_space<vmem>>, vector<32x48xf32>
    %1 = arith.truncf %0 : vector<32x48xf32> to vector<32x48xbf16>
    %c0_1 = arith.constant 0 : index
    %c0_2 = arith.constant 0 : index
    %2 = vector.load %arg2[%c0_1, %c0_2] : memref<48x32xbf16, #tpu.memory_space<vmem>>, vector<48x32xbf16>
    %cst = arith.constant dense<0.000000e+00> : vector<32x32xf32>
    %3 = tpu.matmul %1, %2, %cst {dimension_numbers = #tpu.dot_dimension_numbers<[1], [0], [0], [1], [0, 0, 1, 1], [], []>} : vector<32x48xbf16>, vector<48x32xbf16>, vector<32x32xf32> -> vector<32x32xf32>
    %c0_3 = arith.constant 0 : index
    %c0_4 = arith.constant 0 : index
    %4 = vector.load %arg3[%c0_3, %c0_4] : memref<1x32xf32, #tpu.memory_space<vmem>>, vector<1x32xf32>
    %5 = vector.broadcast %4 : vector<1x32xf32> to vector<32x32xf32>
    %6 = arith.addf %3, %5 : vector<32x32xf32>
    %c0_5 = arith.constant 0 : index
    %c0_6 = arith.constant 0 : index
    %7 = vector.load %arg4[%c0_5, %c0_6] : memref<32x32xf32, #tpu.memory_space<vmem>>, vector<32x32xf32>
    tpu.vector_store %arg4[%c0_5, %c0_6], %6 {strides = array<i32>} : memref<32x32xf32, #tpu.memory_space<vmem>>, vector<32x32xf32>,
    return
  }
  func.func @transform_0(%arg0: i32) -> (i32, i32) {
    %c0_i32 = arith.constant 0 : i32
    %c0_i32_0 = arith.constant 0 : i32
    return %arg0, %c0_i32 : i32, i32
  }
  func.func @transform_1(%arg0: i32) -> (i32, i32) {
    %c0_i32 = arith.constant 0 : i32
    %c0_i32_0 = arith.constant 0 : i32
    %c0_i32_1 = arith.constant 0 : i32
    return %c0_i32, %c0_i32_0 : i32, i32
  }
  func.func @transform_2(%arg0: i32) -> (i32, i32) {
    %c0_i32 = arith.constant 0 : i32
    %c0_i32_0 = arith.constant 0 : i32
    %c0_i32_1 = arith.constant 0 : i32
    return %c0_i32, %c0_i32_0 : i32, i32
  }
  func.func @transform_3(%arg0: i32) -> (i32, i32) {
    %c0_i32 = arith.constant 0 : i32
    %c0_i32_0 = arith.constant 0 : i32
    return %arg0, %c0_i32 : i32, i32
  }
}

</mosaic_0001>

<bundles_post_ra>
// kernel: tpu_custom_call.1
= control target key start
LH: loop header
LB: loop body
LE: loop exit
PB: predicated region body
PF: predicated region fallthrough
CT: control target
= control target key end

     0   :  { %s203_s0 = inlined_call_operand.vmem [shape: f32[32,48], index: 0, kind: input, shape index: {}]   ;;  %s204_s1 = inlined_call_operand.vmem [shape: bf16[48,32], index: 1, kind: input, shape index: {}]   ;;  %s205_s2 = inlined_call_operand.vmem [shape: f32[1,32], index: 2, kind: input, shape index: {}]   ;;  %s206_s3 = inlined_call_operand.hbm [shape: f32[32,32], index: 3, kind: output, shape index: {}]  }
   0x1   :  { %v115_v0 = vld [vmem:[%s204_s1 + $0x10] sm:$0xff]  ;;  %v114_v1 = vld [vmem:[%s204_s1 + $0x8] sm:$0xff] }
   0x2   :  { %62 = vmatpush.bf16.msra.mxu0 %v115_v0  ;;  %116 = vmatpush.bf16.msra.mxu1 %v115_v0 }
   0x3   :  { %8 = vsyncpa [#allocation3], 0  ;;  %v113_v2 = vld [vmem:[%s204_s1] sm:$0xff]  ;;  %v17_v4 = vld [vmem:[%s203_s0 + $0x8] sm:$0xff]  ;;  %vm50_vm0 = vcmask 392192   ;;  %vm76_vm1 = vcmask 261120  }
   0x4   :  { %v16_v3 = vld [vmem:[%s203_s0] sm:$0xff]  ;;  %v18_v5 = vld [vmem:[%s203_s0 + $0x10] sm:$0xff]  ;;  %v19_v6 = vld [vmem:[%s203_s0 + $0x18] sm:$0xff]  ;;  %s149_s0 = smov [#allocation2]   ;;  %s87_s30 = sshll.u32 %s206_s3, 4  ;;  %s88_s30 = int_to_ptr.hbm [resolvable:$true] %s87_s30 }
   0x5   :  { %v20_v7 = vpack.c.bf16 %v17_v4, %v16_v3  ;;  %v21_v8 = vpack.c.bf16 %v19_v6, %v18_v5  ;;  %v122_v9 = vld [vmem:[%s205_s2] ss:$0 sm:$0xff]  ;;  %s85_s27 = sshll.u32 %s149_s0, 4  ;;  %s150_s2 = smov 128   ;;  %s86_s27 = int_to_ptr.vmem [resolvable:$true] %s85_s27 }
   0x6   :  { %63 = vmatpush.bf16.msra.mxu0 %v114_v1  ;;  %117 = vmatpush.bf16.msra.mxu1 %v114_v1  ;;  %s151_s4 = smov 8  }
   0xa   :  { %64 = vmatpush.bf16.msra.mxu0 %v113_v2  ;;  %118 = vmatpush.bf16.msra.mxu1 %v113_v2 }
   0xd   :  { %111 = vmatmul.msk.bf16.vlgmr.msra.gmra.mxu0 %vm50_vm0, %v20_v7  ;;  %112 = vmatmul.msk.bf16.vlgmr.msra.gmra.mxu1 %vm50_vm0, %v21_v8 }
  0x8a   :  { %v66_v10 = vpop.f32.mrf.mxu0  ;;  %v71_v11 = vpop.f32.mrf.mxu1 }
  0x8b   :  { %v67_v12 = vadd.f32 %v122_v9, %v66_v10  ;;  %v72_v13 = vadd.f32 %v122_v9, %v71_v11 }
  0x8d   :  { %77 = vst.msk [vmem:[#allocation2] sm:$0xff] %vm76_vm1, %v67_v12 }
  0x8e   :  { %79 = vst.msk [vmem:[#allocation2 + $0x10] sm:$0xff] %vm76_vm1, %v72_v13 }
  0x92   :  { %v68_v14 = vpop.f32.mrf.mxu0  ;;  %v73_v15 = vpop.f32.mrf.mxu1 }
  0x93   :  { %v69_v16 = vadd.f32 %v122_v9, %v68_v14  ;;  %v74_v17 = vadd.f32 %v122_v9, %v73_v15 }
  0x95   :  { %78 = vst.msk [vmem:[#allocation2 + $0x8] sm:$0xff] %vm76_vm1, %v69_v16 }
  0x96   :  { %80 = vst.msk [vmem:[#allocation2 + $0x18] sm:$0xff] %vm76_vm1, %v74_v17 }
  0x97   :  { %93 = dma.vmem_to_hbm [thread:$0]  %s86_s27, 512, %s88_s30, [#allocation3], %s150_s2, %s150_s2, %s151_s4  }
  0x98   :  { %147 = dma.done.wait [#allocation3], 512  }
  0x99   :  { %148 = vsyncadd [#allocation3], 4294966784 }
  0x9a   :  { %98 = vsyncpa [#allocation3], 1 }

</bundles_post_ra>
